<compile_context>
chip_gen: v6e
topology: v6e:2x2x1
jax: 0.10.0
libtpu: 0.0.40
codegen_flags: <defaults>
</compile_context>

<pallas_src>
import functools

import jax
import jax.numpy as jnp
from jax import lax
from jax.experimental import pallas as pl
from jax.experimental.pallas import tpu as pltpu

_MIB = 1024 * 1024
_VMEM_BUDGET = 20 * _MIB      # target per-step working set (tiles shrink above this)
_VMEM_LIMIT_CAP = 48 * _MIB   # stay below v7x's 64 MiB physical VMEM


def _pick_tile(n, candidates):
    """Largest candidate that evenly divides n (falls back to n itself)."""
    for c in candidates:
        if n % c == 0:
            return c
    return n


def _pick_row_tile(n):
    """MXU/lane-friendly row tile; prefer leaving >= 2 row blocks so the
    "parallel" axis gives v7x megacore sharding something to split."""
    for c in (512, 256, 128):
        if n % c == 0 and n // c >= 2:
            return c
    for c in (512, 256, 128):
        if n % c == 0:
            return c
    return n


# --------------------------------------------------------------------------- #
# Stage 1: normalize rows + per-pair positives
# --------------------------------------------------------------------------- #
def _normalize_kernel(emb_i_ref, emb_j_ref, z_ref, pos_ref):
    # emb_i_ref, emb_j_ref : VMEM (TILE_B, Dp) f32
    # z_ref                : VMEM (2, TILE_B, Dp) f32/bf16   [0]=z_i, [1]=z_j
    # pos_ref              : VMEM (TILE_B, 1) f32            p[k] = z_i[k].z_j[k]
    eps = 1e-12  # F.normalize default eps: x / max(||x||, eps)
    xi = emb_i_ref[...]
    xj = emb_j_ref[...]
    # rsqrt(max(sum(x^2), eps^2)) == 1 / max(||x||, eps)   (sqrt is monotone)
    inv_ni = lax.rsqrt(jnp.maximum(jnp.sum(xi * xi, axis=1, keepdims=True), eps * eps))
    inv_nj = lax.rsqrt(jnp.maximum(jnp.sum(xj * xj, axis=1, keepdims=True), eps * eps))
    zi = xi * inv_ni
    zj = xj * inv_nj
    # Positives stay exact f32; z is emitted once in the MXU dtype (bf16/f32).
    pos_ref[...] = jnp.sum(zi * zj, axis=1, keepdims=True)
    z_ref[0, :, :] = zi.astype(z_ref.dtype)
    z_ref[1, :, :] = zj.astype(z_ref.dtype)


# --------------------------------------------------------------------------- #
# Stage 2: K-blocked NT-Xent denominator
# --------------------------------------------------------------------------- #
def _ntxent_kernel(temp_ref, rows_ref, cols_ref, loss_ref, acc_ref):
    # temp_ref : SMEM (1,) f32
    # rows_ref : VMEM (TILE_N, Dp) bf16/f32 -- query rows (constant across k)
    # cols_ref : VMEM (TILE_K, Dp) bf16/f32 -- current key/column block
    # loss_ref : VMEM (TILE_N, 1) f32       -- per-row log-denominator term
    # acc_ref  : VMEM (TILE_N, 1) f32 scratch -- running sum of shifted exps
    k = pl.program_id(1)

    @pl.when(k == 0)
    def _():
        acc_ref[...] = jnp.zeros_like(acc_ref)

    inv_temp = 1.0 / temp_ref[0]  # one scalar reciprocal, not N*N divides

    # Cosine similarity of already-normalized rows == dot product (MXU, f32 acc).
    sim = lax.dot_general(
        rows_ref[...], cols_ref[...],
        dimension_numbers=(((1,), (1,)), ((), ())),
        preferred_element_type=jnp.float32,
    )  # (TILE_N, TILE_K)

    # Stable shifted exp: sim <= ~1 after normalization, so shift by 1/temp.
    e = jnp.exp((sim - 1.0) * inv_temp)
    # Row-sum per key block, reduced over k blocks in the VMEM accumulator.
    acc_ref[...] += jnp.sum(e, axis=1, keepdims=True)

    @pl.when(k == pl.num_programs(1) - 1)
    def _():
        # Remove the self-similarity term analytically, computed from the
        # actual (possibly bf16-rounded) query rows so the bf16 path is
        # unbiased (diag(sim) is ~1 but not exactly 1 in bf16).
        q = rows_ref[...].astype(jnp.float32)
        self_sim = jnp.sum(q * q, axis=1, keepdims=True)
        self_e = jnp.exp((self_sim - 1.0) * inv_temp)
        loss_ref[...] = jnp.log(acc_ref[...] - self_e)


# --------------------------------------------------------------------------- #
# Wrapper
# --------------------------------------------------------------------------- #
@functools.partial(
    jax.jit,
    static_argnames=("batch_size", "use_bf16_matmul", "row_tile", "col_tile"))
def simclr_loss(emb_i, emb_j, temperature, *, batch_size,
                use_bf16_matmul=True, row_tile=None, col_tile=None):
    # Glue: torch.squeeze(emb_j, -1)
    emb_j = jnp.squeeze(emb_j, axis=-1)
    B, D = emb_i.shape
    assert B == batch_size and emb_j.shape == (B, D)
    N = 2 * B

    emb_i = emb_i.astype(jnp.float32)
    emb_j = emb_j.astype(jnp.float32)

    # Lane-align the feature dim; zero columns change neither norms nor dots.
    Dp = ((D + 127) // 128) * 128
    if Dp != D:
        pad = ((0, 0), (0, Dp - D))
        emb_i = jnp.pad(emb_i, pad)
        emb_j = jnp.pad(emb_j, pad)

    z_dtype = jnp.bfloat16 if use_bf16_matmul else jnp.float32
    z_item = jnp.dtype(z_dtype).itemsize

    # ---- Stage 1: normalize rows + positives --------------------------------
    tile_b = _pick_tile(B, (512, 256, 128, 64, 32, 16, 8))

    def s1_bytes(tb):
        return (2 * (2 * tb * Dp * 4)          # emb_i + emb_j blocks, double-buffered
                + 2 * (2 * tb * Dp * z_item)   # z (2, tb, Dp) block, double-buffered
                + 2 * (tb * 128 * 4))          # pos (tb, 1) block, lane-padded

    while s1_bytes(tile_b) > _VMEM_BUDGET and tile_b >= 16 and tile_b % 16 == 0:
        tile_b //= 2
    s1_limit = min(_VMEM_LIMIT_CAP, max(16 * _MIB, 2 * s1_bytes(tile_b)))

    z, pos = pl.pallas_call(
        _normalize_kernel,
        out_shape=(
            jax.ShapeDtypeStruct((2, B, Dp), z_dtype),
            jax.ShapeDtypeStruct((B, 1), jnp.float32),
        ),
        grid=(B // tile_b,),
        in_specs=[
            pl.BlockSpec((tile_b, Dp), lambda i: (i, 0)),
            pl.BlockSpec((tile_b, Dp), lambda i: (i, 0)),
        ],
        out_specs=(
            pl.BlockSpec((2, tile_b, Dp), lambda i: (0, i, 0)),
            pl.BlockSpec((tile_b, 1), lambda i: (i, 0)),
        ),
        compiler_params=pltpu.CompilerParams(
            dimension_semantics=("parallel",),
            vmem_limit_bytes=s1_limit,
        ),
    )(emb_i, emb_j)

    # representations = cat([z_i, z_j], dim=0): free reshape of (2, B, Dp).
    reps = z.reshape(N, Dp)

    # ---- Stage 2: K-blocked similarity / log-denominator --------------------
    tile_n = row_tile if row_tile is not None else _pick_row_tile(N)
    tile_k = col_tile if col_tile is not None else _pick_tile(N, (512, 256, 128))
    assert N % tile_n == 0 and N % tile_k == 0

    def s2_bytes(tn, tk):
        return (2 * tn * Dp * z_item       # query rows block, double-buffered
                + 2 * tk * Dp * z_item     # key block, double-buffered
                + 2 * tn * 128 * 4         # (tn, 1) loss block, lane-padded
                + tn * 128 * 4             # (tn, 1) accumulator scratch
                + 2 * tn * tk * 4)         # sim / exp intermediates

    while s2_bytes(tile_n, tile_k) > _VMEM_BUDGET and tile_k % 256 == 0:
        tile_k //= 2
    while s2_bytes(tile_n, tile_k) > _VMEM_BUDGET and tile_n % 256 == 0:
        tile_n //= 2
    s2_limit = min(_VMEM_LIMIT_CAP, max(16 * _MIB, 2 * s2_bytes(tile_n, tile_k)))

    temp = jnp.asarray(temperature, dtype=jnp.float32).reshape((1,))

    loss_rows = pl.pallas_call(
        _ntxent_kernel,
        out_shape=jax.ShapeDtypeStruct((N, 1), jnp.float32),
        grid=(N // tile_n, N // tile_k),
        in_specs=[
            pl.BlockSpec(memory_space=pltpu.MemorySpace.SMEM),   # temperature
            pl.BlockSpec((tile_n, Dp), lambda i, k: (i, 0)),     # query rows
            pl.BlockSpec((tile_k, Dp), lambda i, k: (k, 0)),     # key block
        ],
        out_specs=pl.BlockSpec((tile_n, 1), lambda i, k: (i, 0)),
        scratch_shapes=[pltpu.VMEM((tile_n, 1), jnp.float32)],
        compiler_params=pltpu.CompilerParams(
            dimension_semantics=("parallel", "arbitrary"),
            vmem_limit_bytes=s2_limit,
        ),
    )(temp, reps, reps)

    # loss_r = 1/t + log(sum_j exp((sim_rj-1)/t) - exp((self_r-1)/t)) - pos_r/t,
    # and rows r, r+B share the same positive pos[r]:
    t = jnp.asarray(temperature, jnp.float32)
    n_f = jnp.float32(N)
    return (jnp.sum(loss_rows) + (n_f - 2.0 * jnp.sum(pos)) / t) / n_f


# --------------------------------------------------------------------------- #
# Pure-JAX reference mirroring the PyTorch forward
# --------------------------------------------------------------------------- #
def _reference_loss(emb_i, emb_j, temperature, batch_size):
    emb_j = jnp.squeeze(emb_j, axis=-1)
    eps = 1e-12
    zi = emb_i / jnp.maximum(jnp.linalg.norm(emb_i, axis=1, keepdims=True), eps)
    zj = emb_j / jnp.maximum(jnp.linalg.norm(emb_j, axis=1, keepdims=True), eps)
    reps = jnp.concatenate([zi, zj], axis=0)
    sim = reps @ reps.T
    B = batch_size
    sim_ij = jnp.diagonal(sim, offset=B)
    sim_ji = jnp.diagonal(sim, offset=-B)
    positives = jnp.concatenate([sim_ij, sim_ji], axis=0)
    nominator = jnp.exp(positives / temperature)
    neg_mask = 1.0 - jnp.eye(2 * B, dtype=jnp.float32)
    denominator = jnp.sum(neg_mask * jnp.exp(sim / temperature), axis=1)
    loss_partial = -jnp.log(nominator / denominator)
    return jnp.sum(loss_partial) / (2 * B)


if __name__ == "__main__":
    batch_size = 8
    feat_dim = 32
    temperature = 0.5

    key = jax.random.PRNGKey(0)
    k1, k2 = jax.random.split(key)
    emb_i = jax.random.normal(k1, (batch_size, feat_dim), dtype=jnp.float32)
    emb_j = jax.random.normal(k2, (batch_size, feat_dim, 1), dtype=jnp.float32)

    ref = _reference_loss(emb_i, emb_j, temperature, batch_size)

    # Exact-parity path (f32 MXU operands).
    loss_f32 = simclr_loss(emb_i, emb_j, temperature, batch_size=batch_size,
                           use_bf16_matmul=False)
    loss_f32 = jax.block_until_ready(loss_f32)
    assert jnp.allclose(loss_f32, ref, rtol=1e-5, atol=1e-5), (loss_f32, ref)

    # Default fast path (bf16 MXU operands, f32 accumulation, exact positives).
    loss_bf16 = simclr_loss(emb_i, emb_j, temperature, batch_size=batch_size)
    loss_bf16 = jax.block_until_ready(loss_bf16)
    assert jnp.allclose(loss_bf16, ref, rtol=5e-2, atol=5e-2), (loss_bf16, ref)

    # Exercise the blocked grid (2 row blocks x 2 key blocks -> accumulator
    # init/finalize across the "arbitrary" axis) at a slightly larger shape.
    b2, d2 = 128, 64
    k3, k4 = jax.random.split(jax.random.PRNGKey(1))
    e_i2 = jax.random.normal(k3, (b2, d2), dtype=jnp.float32)
    e_j2 = jax.random.normal(k4, (b2, d2, 1), dtype=jnp.float32)
    ref2 = _reference_loss(e_i2, e_j2, temperature, b2)
    loss2 = simclr_loss(e_i2, e_j2, temperature, batch_size=b2,
                        row_tile=128, col_tile=128)
    loss2 = jax.block_until_ready(loss2)
    assert jnp.allclose(loss2, ref2, rtol=5e-2, atol=5e-2), (loss2, ref2)

    print("KERNEL_OK")
</pallas_src>

<mosaic_0001>
module attributes {stable_mosaic.version = 11 : i64} {
  func.func @_normalize_kernel(%arg0: i32, %arg1: memref<8x128xf32, #tpu.memory_space<vmem>>, %arg2: memref<8x128xf32, #tpu.memory_space<vmem>>, %arg3: memref<2x8x128xf32, #tpu.memory_space<vmem>>, %arg4: memref<8x1xf32, #tpu.memory_space<vmem>>) attributes {dimension_semantics = [#tpu.dimension_semantics<parallel>], iteration_bounds = array<i64: 1>, scalar_prefetch = 0 : i64, scratch_operands = 0 : i64, tpu.core_type = #tpu.core_type<tc>, window_params = [{transform_indices = @transform_0, window_bounds = array<i64: 8, 128>}, {transform_indices = @transform_1, window_bounds = array<i64: 8, 128>}, {transform_indices = @transform_2, window_bounds = array<i64: 2, 8, 128>}, {transform_indices = @transform_3, window_bounds = array<i64: 8, 1>}]} {
    %c0 = arith.constant 0 : index
    %c0_0 = arith.constant 0 : index
    %0 = vector.load %arg1[%c0, %c0_0] : memref<8x128xf32, #tpu.memory_space<vmem>>, vector<8x128xf32>
    %c0_1 = arith.constant 0 : index
    %c0_2 = arith.constant 0 : index
    %1 = vector.load %arg2[%c0_1, %c0_2] : memref<8x128xf32, #tpu.memory_space<vmem>>, vector<8x128xf32>
    %2 = arith.mulf %0, %0 : vector<8x128xf32>
    %cst = arith.constant dense<0.000000e+00> : vector<8xf32>
    %3 = vector.multi_reduction <add>, %2, %cst [1] : vector<8x128xf32> to vector<8xf32>
    %4 = vector.shape_cast %3 : vector<8xf32> to vector<8x1xf32>
    %cst_3 = arith.constant 1.000000e-24 : f32
    %5 = vector.broadcast %cst_3 : f32 to vector<8x1xf32>
    %6 = arith.maximumf %4, %5 : vector<8x1xf32>
    %7 = math.rsqrt %6 : vector<8x1xf32>
    %8 = arith.mulf %1, %1 : vector<8x128xf32>
    %cst_4 = arith.constant dense<0.000000e+00> : vector<8xf32>
    %9 = vector.multi_reduction <add>, %8, %cst_4 [1] : vector<8x128xf32> to vector<8xf32>
    %10 = vector.shape_cast %9 : vector<8xf32> to vector<8x1xf32>
    %cst_5 = arith.constant 1.000000e-24 : f32
    %11 = vector.broadcast %cst_5 : f32 to vector<8x1xf32>
    %12 = arith.maximumf %10, %11 : vector<8x1xf32>
    %13 = math.rsqrt %12 : vector<8x1xf32>
    %14 = vector.broadcast %7 : vector<8x1xf32> to vector<8x128xf32>
    %15 = arith.mulf %0, %14 : vector<8x128xf32>
    %16 = vector.broadcast %13 : vector<8x1xf32> to vector<8x128xf32>
    %17 = arith.mulf %1, %16 : vector<8x128xf32>
    %18 = arith.mulf %15, %17 : vector<8x128xf32>
    %cst_6 = arith.constant dense<0.000000e+00> : vector<8xf32>
    %19 = vector.multi_reduction <add>, %18, %cst_6 [1] : vector<8x128xf32> to vector<8xf32>
    %20 = vector.shape_cast %19 : vector<8xf32> to vector<8x1xf32>
    %c0_7 = arith.constant 0 : index
    %c0_8 = arith.constant 0 : index
    %21 = vector.load %arg4[%c0_7, %c0_8] : memref<8x1xf32, #tpu.memory_space<vmem>>, vector<8x1xf32>
    tpu.vector_store %arg4[%c0_7, %c0_8], %20 {strides = array<i32>} : memref<8x1xf32, #tpu.memory_space<vmem>>, vector<8x1xf32>,
    %c0_9 = arith.constant 0 : index
    %c0_10 = arith.constant 0 : index
    %c0_11 = arith.constant 0 : index
    %22 = vector.load %arg3[%c0_9, %c0_10, %c0_11] : memref<2x8x128xf32, #tpu.memory_space<vmem>>, vector<1x8x128xf32>
    %23 = vector.shape_cast %22 : vector<1x8x128xf32> to vector<8x128xf32>
    %24 = vector.shape_cast %15 : vector<8x128xf32> to vector<1x8x128xf32>
    tpu.vector_store %arg3[%c0_9, %c0_10, %c0_11], %24 {strides = array<i32>} : memref<2x8x128xf32, #tpu.memory_space<vmem>>, vector<1x8x128xf32>,
    %c1 = arith.constant 1 : index
    %c0_12 = arith.constant 0 : index
    %c0_13 = arith.constant 0 : index
    %25 = vector.load %arg3[%c1, %c0_12, %c0_13] : memref<2x8x128xf32, #tpu.memory_space<vmem>>, vector<1x8x128xf32>
    %26 = vector.shape_cast %25 : vector<1x8x128xf32> to vector<8x128xf32>
    %27 = vector.shape_cast %17 : vector<8x128xf32> to vector<1x8x128xf32>
    tpu.vector_store %arg3[%c1, %c0_12, %c0_13], %27 {strides = array<i32>} : memref<2x8x128xf32, #tpu.memory_space<vmem>>, vector<1x8x128xf32>,
    return
  }
  func.func @transform_0(%arg0: i32) -> (i32, i32) {
    %c0_i32 = arith.constant 0 : i32
    %c0_i32_0 = arith.constant 0 : i32
    return %arg0, %c0_i32 : i32, i32
  }
  func.func @transform_1(%arg0: i32) -> (i32, i32) {
    %c0_i32 = arith.constant 0 : i32
    %c0_i32_0 = arith.constant 0 : i32
    return %arg0, %c0_i32 : i32, i32
  }
  func.func @transform_2(%arg0: i32) -> (i32, i32, i32) {
    %c0_i32 = arith.constant 0 : i32
    %c0_i32_0 = arith.constant 0 : i32
    %c0_i32_1 = arith.constant 0 : i32
    return %c0_i32, %arg0, %c0_i32_0 : i32, i32, i32
  }
  func.func @transform_3(%arg0: i32) -> (i32, i32) {
    %c0_i32 = arith.constant 0 : i32
    %c0_i32_0 = arith.constant 0 : i32
    return %arg0, %c0_i32 : i32, i32
  }
}

module attributes {stable_mosaic.version = 11 : i64} {
  func.func @_ntxent_kernel(%arg0: i32, %arg1: i32, %arg2: memref<1xf32, #tpu.memory_space<smem>>, %arg3: memref<16x128xf32, #tpu.memory_space<vmem>>, %arg4: memref<16x128xf32, #tpu.memory_space<vmem>>, %arg5: memref<16x1xf32, #tpu.memory_space<vmem>>, %arg6: memref<16x1xf32, #tpu.memory_space<vmem>>) attributes {dimension_semantics = [#tpu.dimension_semantics<parallel>, #tpu.dimension_semantics<arbitrary>], iteration_bounds = array<i64: 1, 1>, scalar_prefetch = 0 : i64, scratch_operands = 1 : i64, tpu.core_type = #tpu.core_type<tc>, window_params = [{transform_indices = @transform_0, window_bounds = array<i64: 1>}, {transform_indices = @transform_1, window_bounds = array<i64: 16, 128>}, {transform_indices = @transform_2, window_bounds = array<i64: 16, 128>}, {transform_indices = @transform_3, window_bounds = array<i64: 16, 1>}]} {
    %c0_i32 = arith.constant 0 : i32
    %0 = arith.cmpi eq, %arg1, %c0_i32 : i32
    %1 = arith.extui %0 : i1 to i32
    %c0_i32_0 = arith.constant 0 : i32
    %2 = arith.cmpi ne, %1, %c0_i32_0 : i32
    scf.if %2 {
      %cst_14 = arith.constant 0.000000e+00 : f32
      %21 = vector.broadcast %cst_14 : f32 to vector<16x1xf32>
      %c0_15 = arith.constant 0 : index
      %c0_16 = arith.constant 0 : index
      %22 = vector.load %arg6[%c0_15, %c0_16] : memref<16x1xf32, #tpu.memory_space<vmem>>, vector<16x1xf32>
      tpu.vector_store %arg6[%c0_15, %c0_16], %21 {strides = array<i32>} : memref<16x1xf32, #tpu.memory_space<vmem>>, vector<16x1xf32>,
    } else {
    }
    %c0 = arith.constant 0 : index
    %3 = memref.load %arg2[%c0] : memref<1xf32, #tpu.memory_space<smem>>
    %cst = arith.constant 1.000000e+00 : f32
    %4 = arith.divf %cst, %3 : f32
    %c0_1 = arith.constant 0 : index
    %c0_2 = arith.constant 0 : index
    %5 = vector.load %arg3[%c0_1, %c0_2] : memref<16x128xf32, #tpu.memory_space<vmem>>, vector<16x128xf32>
    %c0_3 = arith.constant 0 : index
    %c0_4 = arith.constant 0 : index
    %6 = vector.load %arg4[%c0_3, %c0_4] : memref<16x128xf32, #tpu.memory_space<vmem>>, vector<16x128xf32>
    %cst_5 = arith.constant dense<0.000000e+00> : vector<16x16xf32>
    %7 = tpu.matmul %5, %6, %cst_5 {dimension_numbers = #tpu.dot_dimension_numbers<[1], [1], [0], [0], [0, 0, 1, 0], [], []>} : vector<16x128xf32>, vector<16x128xf32>, vector<16x16xf32> -> vector<16x16xf32>
    %cst_6 = arith.constant 1.000000e+00 : f32
    %8 = vector.broadcast %cst_6 : f32 to vector<16x16xf32>
    %9 = arith.subf %7, %8 : vector<16x16xf32>
    %10 = vector.broadcast %4 : f32 to vector<16x16xf32>
    %11 = arith.mulf %9, %10 : vector<16x16xf32>
    %12 = math.exp %11 : vector<16x16xf32>
    %c0_7 = arith.constant 0 : index
    %c0_8 = arith.constant 0 : index
    %13 = vector.load %arg6[%c0_7, %c0_8] : memref<16x1xf32, #tpu.memory_space<vmem>>, vector<16x1xf32>
    %cst_9 = arith.constant dense<0.000000e+00> : vector<16xf32>
    %14 = vector.multi_reduction <add>, %12, %cst_9 [1] : vector<16x16xf32> to vector<16xf32>
    %15 = vector.shape_cast %14 : vector<16xf32> to vector<16x1xf32>
    %16 = arith.addf %13, %15 : vector<16x1xf32>
    %c0_10 = arith.constant 0 : index
    %c0_11 = arith.constant 0 : index
    %17 = vector.load %arg6[%c0_10, %c0_11] : memref<16x1xf32, #tpu.memory_space<vmem>>, vector<16x1xf32>
    tpu.vector_store %arg6[%c0_10, %c0_11], %16 {strides = array<i32>} : memref<16x1xf32, #tpu.memory_space<vmem>>, vector<16x1xf32>,
    %c0_i32_12 = arith.constant 0 : i32
    %18 = arith.cmpi eq, %arg1, %c0_i32_12 : i32
    %19 = arith.extui %18 : i1 to i32
    %c0_i32_13 = arith.constant 0 : i32
    %20 = arith.cmpi ne, %19, %c0_i32_13 : i32
    scf.if %20 {
      %c0_14 = arith.constant 0 : index
      %c0_15 = arith.constant 0 : index
      %21 = vector.load %arg3[%c0_14, %c0_15] : memref<16x128xf32, #tpu.memory_space<vmem>>, vector<16x128xf32>
      %22 = arith.mulf %21, %21 : vector<16x128xf32>
      %cst_16 = arith.constant dense<0.000000e+00> : vector<16xf32>
      %23 = vector.multi_reduction <add>, %22, %cst_16 [1] : vector<16x128xf32> to vector<16xf32>
      %24 = vector.shape_cast %23 : vector<16xf32> to vector<16x1xf32>
      %cst_17 = arith.constant 1.000000e+00 : f32
      %25 = vector.broadcast %cst_17 : f32 to vector<16x1xf32>
      %26 = arith.subf %24, %25 : vector<16x1xf32>
      %27 = vector.broadcast %4 : f32 to vector<16x1xf32>
      %28 = arith.mulf %26, %27 : vector<16x1xf32>
      %29 = math.exp %28 : vector<16x1xf32>
      %c0_18 = arith.constant 0 : index
      %c0_19 = arith.constant 0 : index
      %30 = vector.load %arg6[%c0_18, %c0_19] : memref<16x1xf32, #tpu.memory_space<vmem>>, vector<16x1xf32>
      %31 = arith.subf %30, %29 : vector<16x1xf32>
      %32 = math.log %31 : vector<16x1xf32>
      %c0_20 = arith.constant 0 : index
      %c0_21 = arith.constant 0 : index
      %33 = vector.load %arg5[%c0_20, %c0_21] : memref<16x1xf32, #tpu.memory_space<vmem>>, vector<16x1xf32>
      tpu.vector_store %arg5[%c0_20, %c0_21], %32 {strides = array<i32>} : memref<16x1xf32, #tpu.memory_space<vmem>>, vector<16x1xf32>,
    } else {
    }
    return
  }
  func.func @transform_0(%arg0: i32, %arg1: i32) -> i32 {
    %c0_i32 = arith.constant 0 : i32
    %c0_i32_0 = arith.constant 0 : i32
    return %c0_i32 : i32
  }
  func.func @transform_1(%arg0: i32, %arg1: i32) -> (i32, i32) {
    %c0_i32 = arith.constant 0 : i32
    %c0_i32_0 = arith.constant 0 : i32
    return %arg0, %c0_i32 : i32, i32
  }
  func.func @transform_2(%arg0: i32, %arg1: i32) -> (i32, i32) {
    %c0_i32 = arith.constant 0 : i32
    %c0_i32_0 = arith.constant 0 : i32
    return %arg1, %c0_i32 : i32, i32
  }
  func.func @transform_3(%arg0: i32, %arg1: i32) -> (i32, i32) {
    %c0_i32 = arith.constant 0 : i32
    %c0_i32_0 = arith.constant 0 : i32
    return %arg0, %c0_i32 : i32, i32
  }
}

</mosaic_0001>

<bundles_post_ra>
// kernel: simclr_loss.2
= control target key start
LH: loop header
LB: loop body
LE: loop exit
PB: predicated region body
PF: predicated region fallthrough
CT: control target
= control target key end

     0   :  { %vm30_vm0 = vcmask 7168   ;;  %s83_s0 = inlined_call_operand.vmem [shape: f32[8,128], index: 0, kind: input, shape index: {}]   ;;  %s84_s1 = inlined_call_operand.vmem [shape: f32[8,128], index: 1, kind: input, shape index: {}]   ;;  %s85_s2 = inlined_call_operand.vmem [shape: f32[2,8,128], index: 2, kind: output, shape index: {0}]   ;;  %s86_s3 = inlined_call_operand.vmem [shape: f32[8,1], index: 3, kind: output, shape index: {1}]  }
   0x1   :  { %v13_v0 = vld [vmem:[%s83_s0] sm:$0xff] }
   0x2   :  { %v14_v1 = vld [vmem:[%s84_s1] sm:$0xff]  ;;  %v15_v2 = vmul.f32 %v13_v0, %v13_v0 }
   0x3   :  { %v20_v3 = vmul.f32 %v14_v1, %v14_v1 }
   0x4   :  { %16 = vadd.xlane.f32.xlu0 %v15_v2 }
   0x8   :  { %21 = vadd.xlane.f32.xlu0 %v20_v3 }
  0x8d   :  { %v17_v4 = vpop.xlane.xlu0 %16 }
  0x8e   :  { %v18_v5 = vmax.f32 %v17_v4, 1e-24 }
  0x90   :  { %44 = vrsqrt.f32 %v18_v5 }
  0x91   :  { %v22_v6 = vpop.xlane.xlu0 %21 }
  0x92   :  { %v23_v7 = vmax.f32 %v22_v6, 1e-24 }
  0x94   :  { %46 = vrsqrt.f32 %v23_v7 }
  0x9d   :  { %v45_v8 = vpop.eup %44 }
  0x9e   :  { %v25_v9 = vmul.f32 %v45_v8, %v13_v0 }
  0xa0   :  { %32 = vst [vmem:[%s85_s2] sm:$0xff] %v25_v9 }
  0xa1   :  { %v47_v10 = vpop.eup %46 }
  0xa2   :  { %v26_v11 = vmul.f32 %v47_v10, %v14_v1 }
  0xa4   :  { %v27_v12 = vmul.f32 %v26_v11, %v25_v9  ;;  %43 = vst [vmem:[%s85_s2 + $0x8] sm:$0xff] %v26_v11 }
  0xa6   :  { %28 = vadd.xlane.f32.xlu1 %v27_v12 }
 0x12f   :  { %v29_v13 = vpop.xlane.xlu1 %28 }
 0x130   :  { %31 = vst.msk [vmem:[%s86_s3] sm:$0xff] %vm30_vm0, %v29_v13 }

// kernel: simclr_loss.3
= control target key start
LH: loop header
LB: loop body
LE: loop exit
PB: predicated region body
PF: predicated region fallthrough
CT: control target
= control target key end

     0   :  { %vm19_vm0 = vcmask 7168   ;;  %v193_v8 = vmov 0.0   ;;  %vm116_vm1 = vcmask 130048   ;;  %s241_s2 = inlined_call_operand.vmem [shape: f32[16,128], index: 2, kind: input, shape index: {}, may-alias: {1,2}]   ;;  %s242_s1 = inlined_call_operand.vmem [shape: f32[16,128], index: 1, kind: input, shape index: {}, may-alias: {1,2}]   ;;  %s243_s0 = inlined_call_operand.<no memory space> [shape: f32[1], index: 0, kind: input, shape index: {}]   ;;  %s244_s3 = inlined_call_operand.vmem [shape: f32[16,1], index: 3, kind: output, shape index: {}]  }
   0x1   :  { %v29_v0 = vld [vmem:[%s241_s2 + $0x8] sm:$0xff]  ;;  %v28_v1 = vld [vmem:[%s241_s2] sm:$0xff]  ;;  %v23_v3 = vstv %s243_s0  ;;  %20 = vst.msk [vmem:[#allocation2] sm:$0xff] %vm19_vm0, %v193_v8  ;;  %21 = vst.msk [vmem:[#allocation2 + $0x8] sm:$0xff] %vm19_vm0, %v193_v8 }
   0x2   :  { %v26_v2 = vld [vmem:[%s242_s1] sm:$0xff]  ;;  %169 = vmatprep.subr.mxu0 %v29_v0  ;;  %179 = vrcp.f32 %v23_v3  ;;  %v27_v5 = vld [vmem:[%s242_s1 + $0x8] sm:$0xff] }
   0x3   :  { %173 = vmatprep.mubr.f32.mxu0 %v26_v2  ;;  %v133_v4 = vmul.f32 %v26_v2, %v26_v2  ;;  %170 = vmatpush3.xpose.msra.mxu0 %v29_v0  ;;  %v134_v6 = vmul.f32 %v27_v5, %v27_v5 }
   0x4   :  { %171 = vmatprep.subr.mxu0 %v28_v1 }
   0x5   :  { %135 = vadd.xlane.f32.xlu0 %v133_v4 }
   0x7   :  { %172 = vmatpush3.xpose.msra.mxu0 %v28_v1 }
   0x8   :  { %v114_v30 = vld [vmem:[#allocation2] sm:$0xff]  ;;  %v115_v33 = vld [vmem:[#allocation2 + $0x8] sm:$0xff] }
   0x9   :  { %137 = vadd.xlane.f32.xlu0 %v134_v6 }
   0xa   :  { %174 = vmatmul.mubr.f32.vlgmr.msra.gmra.mxu0 %v27_v5 }
   0xf   :  { %v180_v7 = vpop.eup %179 }
  0x10   :  { %176 = vpush %v180_v7 }
  0x41   :  { %s177_s0 = spop %176 }
  0x42   :  { %v107_v10 = vstv %s177_s0 }
  0x8e   :  { %v136_v22 = vpop.xlane.xlu0 %135 }
  0x8f   :  { %v163_v23 = vadd.f32 -1.0, %v136_v22 }
  0x91   :  { %v141_v25 = vmul.f32 %v163_v23, %v107_v10 }
  0x92   :  { %v138_v24 = vpop.xlane.xlu0 %137 }
  0x93   :  { %v164_v26 = vadd.f32 -1.0, %v138_v24  ;;  %v143_v27 = vmul.f32 1.442695, %v141_v25 }
  0x95   :  { %v142_v28 = vmul.f32 %v164_v26, %v107_v10 }
  0x97   :  { %v145_v29 = vmul.f32 1.442695, %v142_v28 }
  0xca   :  { %v175_v9 = vpop.f32.mrf.mxu0 }
  0xcb   :  { %v162_v11 = vadd.f32 -1.0, %v175_v9 }
  0xcc   :  { %v96_v12 = vpop.f32.mrf.mxu0 }
  0xcd   :  { %v109_v13 = vmul.f32 %v162_v11, %v107_v10  ;;  %v161_v14 = vadd.f32 -1.0, %v96_v12 }
  0xcf   :  { %v108_v15 = vmul.f32 %v161_v14, %v107_v10  ;;  %v112_v16 = vmul.f32 1.442695, %v109_v13 }
  0xd1   :  { %v110_v17 = vmul.f32 1.442695, %v108_v15 }
  0xd3   :  { %181 = vpow2.f32 %v110_v17 }
  0xd4   :  { %183 = vpow2.f32 %v112_v16 }
  0xd5   :  { %185 = vpow2.f32 %v143_v27 }
  0xd6   :  { %187 = vpow2.f32 %v145_v29 }
  0xe0   :  { %v182_v18 = vpop.eup %181 }
  0xe1   :  { %v117_v19 = vsel %vm116_vm1, %v182_v18, 0.0  ;;  %v184_v20 = vpop.eup %183 }
  0xe2   :  { %118 = vadd.xlane.f32.xlu1 %v117_v19  ;;  %v120_v21 = vsel %vm116_vm1, %v184_v20, 0.0  ;;  %v186_v36 = vpop.eup %185 }
  0xe3   :  { %v188_v39 = vpop.eup %187 }
  0xe6   :  { %121 = vadd.xlane.f32.xlu1 %v120_v21 }
 0x16b   :  { %v119_v31 = vpop.xlane.xlu1 %118 }
 0x16c   :  { %v123_v32 = vadd.f32 %v119_v31, %v114_v30 }
 0x16e   :  { %126 = vst.msk [vmem:[#allocation2] sm:$0xff] %vm19_vm0, %v123_v32 }
 0x16f   :  { %v122_v34 = vpop.xlane.xlu1 %121 }
 0x170   :  { %v124_v35 = vadd.f32 %v122_v34, %v115_v33 }
 0x172   :  { %127 = vst.msk [vmem:[#allocation2 + $0x8] sm:$0xff] %vm19_vm0, %v124_v35 }
 0x175   :  { %v147_v37 = vld [vmem:[#allocation2] sm:$0xff] }
 0x176   :  { %v149_v38 = vsub.f32 %v147_v37, %v186_v36 }
 0x178   :  { %189 = vlog2.f32 %v149_v38 }
 0x179   :  { %v148_v40 = vld [vmem:[#allocation2 + $0x8] sm:$0xff] }
 0x17a   :  { %v150_v41 = vsub.f32 %v148_v40, %v188_v39 }
 0x17c   :  { %191 = vlog2.f32 %v150_v41 }
 0x185   :  { %v190_v42 = vpop.eup %189 }
 0x186   :  { %v152_v43 = vmul.f32 0.6931472, %v190_v42 }
 0x188   :  { %155 = vst.msk [vmem:[%s244_s3] sm:$0xff] %vm19_vm0, %v152_v43 }
 0x189   :  { %v192_v44 = vpop.eup %191 }
 0x18a   :  { %v154_v45 = vmul.f32 0.6931472, %v192_v44 }
 0x18c   :  { %156 = vst.msk [vmem:[%s244_s3 + $0x8] sm:$0xff] %vm19_vm0, %v154_v45 }

</bundles_post_ra>
